<compile_context>
chip_gen: v7x
topology: tpu7x:2x2x1
jax: 0.10.0
libtpu: 0.0.40
codegen_flags: <defaults>
</compile_context>

<pallas_src>
import jax
import jax.numpy as jnp
from jax.experimental import pallas as pl
from jax.experimental.pallas import tpu as pltpu

LANE = 128  # TPU vreg lane width; pad narrow feature dims up to this.


def deepnet_kernel(x_ref, w1_ref, w2_ref, o_ref):
    # x_ref:  (TB, n_input)    bf16
    # w1_ref: (n_input, 128)   bf16   fc_h1.weight.T zero-padded 16 -> 128
    # w2_ref: (128, 128)       bf16   fc_out.weight.T zero-padded (16,4)->(128,128)
    # o_ref:  (TB, 128)        f32    columns [4:] are zeros, sliced off outside
    h = jnp.dot(x_ref[...], w1_ref[...], preferred_element_type=jnp.float32)
    h = jnp.maximum(h, 0.0)                      # ReLU on the VPU
    h = h.astype(jnp.bfloat16)                   # keep MXU on bf16 fast path
    o_ref[...] = jnp.dot(h, w2_ref[...], preferred_element_type=jnp.float32)


def prepare_params(w1, w2, dtype=jnp.bfloat16):
    """One-time weight prep (outside the hot path): transpose + pad + cast.

    w1: (16, n_input) = fc_h1.weight     w2: (4, 16) = fc_out.weight
    Returns w1t_pad (n_input, 128), w2t_pad (128, 128), lane-dense, bf16.
    """
    hidden, n_input = w1.shape
    n_out = w2.shape[0]
    w1t_pad = jnp.zeros((n_input, LANE), dtype).at[:, :hidden].set(
        w1.T.astype(dtype))
    w2t_pad = jnp.zeros((LANE, LANE), dtype).at[:hidden, :n_out].set(
        w2.T.astype(dtype))
    return w1t_pad, w2t_pad


def _round_up(x, m):
    return ((x + m - 1) // m) * m


def deepnet_forward(x, w1t_pad, w2t_pad, *, tb=256, n_out=4):
    """x: (B, n_input) f32; prepared weights from prepare_params. Returns (B, 4) f32."""
    B, n_input = x.shape

    # Effective batch tile: multiple of 8 (sublane), capped by the batch size.
    tb_eff = min(tb, _round_up(B, 8))
    b_pad = _round_up(B, tb_eff)
    num_blocks = b_pad // tb_eff

    xb = x.astype(jnp.bfloat16)
    if b_pad != B:
        xb = jnp.pad(xb, ((0, b_pad - B), (0, 0)))

    flops = 2 * b_pad * n_input * LANE + 2 * b_pad * LANE * LANE
    bytes_accessed = (b_pad * n_input * 2          # x (bf16)
                      + n_input * LANE * 2         # w1 (bf16)
                      + LANE * LANE * 2            # w2 (bf16)
                      + b_pad * LANE * 4)          # out slab (f32)

    out_pad = pl.pallas_call(
        deepnet_kernel,
        out_shape=jax.ShapeDtypeStruct((b_pad, LANE), jnp.float32),
        grid=(num_blocks,),
        in_specs=[
            pl.BlockSpec((tb_eff, n_input), lambda i: (i, 0)),   # x tile
            pl.BlockSpec((n_input, LANE), lambda i: (0, 0)),     # W1 resident
            pl.BlockSpec((LANE, LANE), lambda i: (0, 0)),        # W2 resident
        ],
        out_specs=pl.BlockSpec((tb_eff, LANE), lambda i: (i, 0)),
        compiler_params=pltpu.CompilerParams(
            dimension_semantics=("parallel",)),
        cost_estimate=pl.CostEstimate(
            flops=flops, transcendentals=0, bytes_accessed=bytes_accessed),
    )(xb, w1t_pad, w2t_pad)

    return out_pad[:B, :n_out]


if __name__ == "__main__":
    key = jax.random.PRNGKey(0)
    k_x, k_w1, k_w2 = jax.random.split(key, 3)

    batch = 1024     # enough work to amortize launch overhead (4 grid steps)
    n_input = 16     # e.g. a 4x4 grid-world one-hot / feature vector

    # Parameter init matching torch.nn.init.uniform_ ranges (bias=False in spec).
    w1 = jax.random.uniform(k_w1, (16, n_input), dtype=jnp.float32,
                            minval=0.0, maxval=0.1)   # fc_h1.weight
    w2 = jax.random.uniform(k_w2, (4, 16), dtype=jnp.float32,
                            minval=0.0, maxval=0.01)  # fc_out.weight
    x = jax.random.uniform(k_x, (batch, n_input), dtype=jnp.float32)

    w1t_pad, w2t_pad = prepare_params(w1, w2)

    out = deepnet_forward(x, w1t_pad, w2t_pad)
    out = jax.block_until_ready(out)
    assert out.shape == (batch, 4)

    # Reference 1: bf16-emulated math (same rounding the kernel sees, f32 acc).
    xb = x.astype(jnp.bfloat16).astype(jnp.float32)
    w1b = w1.astype(jnp.bfloat16).astype(jnp.float32)
    w2b = w2.astype(jnp.bfloat16).astype(jnp.float32)
    h = jnp.maximum(xb @ w1b.T, 0.0).astype(jnp.bfloat16).astype(jnp.float32)
    ref_bf16 = h @ w2b.T
    assert jnp.allclose(out, ref_bf16, atol=1e-3, rtol=1e-3)

    # Reference 2: full-f32 forward semantics of the PyTorch module.
    ref_f32 = jnp.maximum(x @ w1.T, 0.0) @ w2.T
    assert jnp.allclose(out, ref_f32, atol=2e-2, rtol=2e-2)

    # TODO(synk): the SGD optimizer in __init__ is training state, not part of
    # the forward pass, so it is intentionally not implemented in the kernel.
    print("KERNEL_OK")
</pallas_src>

<mosaic_0001>
module attributes {stable_mosaic.version = 11 : i64} {
  func.func @deepnet_kernel(%arg0: i32, %arg1: memref<256x16xbf16, #tpu.memory_space<vmem>>, %arg2: memref<16x128xbf16, #tpu.memory_space<vmem>>, %arg3: memref<128x128xbf16, #tpu.memory_space<vmem>>, %arg4: memref<256x128xf32, #tpu.memory_space<vmem>>) attributes {dimension_semantics = [#tpu.dimension_semantics<parallel>], iteration_bounds = array<i64: 4>, scalar_prefetch = 0 : i64, scratch_operands = 0 : i64, tpu.core_type = #tpu.core_type<tc>, window_params = [{transform_indices = @transform_0, window_bounds = array<i64: 256, 16>}, {pipeline_mode = #tpu.pipeline_mode<synchronous>, transform_indices = @transform_1, window_bounds = array<i64: 16, 128>}, {pipeline_mode = #tpu.pipeline_mode<synchronous>, transform_indices = @transform_2, window_bounds = array<i64: 128, 128>}, {transform_indices = @transform_3, window_bounds = array<i64: 256, 128>}]} {
    %c0 = arith.constant 0 : index
    %c0_0 = arith.constant 0 : index
    %0 = vector.load %arg1[%c0, %c0_0] : memref<256x16xbf16, #tpu.memory_space<vmem>>, vector<256x16xbf16>
    %c0_1 = arith.constant 0 : index
    %c0_2 = arith.constant 0 : index
    %1 = vector.load %arg2[%c0_1, %c0_2] : memref<16x128xbf16, #tpu.memory_space<vmem>>, vector<16x128xbf16>
    %cst = arith.constant dense<0.000000e+00> : vector<256x128xf32>
    %2 = tpu.matmul %0, %1, %cst {dimension_numbers = #tpu.dot_dimension_numbers<[1], [0], [0], [1], [0, 0, 1, 1], [], []>} : vector<256x16xbf16>, vector<16x128xbf16>, vector<256x128xf32> -> vector<256x128xf32>
    %cst_3 = arith.constant 0.000000e+00 : f32
    %3 = vector.broadcast %cst_3 : f32 to vector<256x128xf32>
    %4 = arith.maximumf %2, %3 : vector<256x128xf32>
    %5 = arith.truncf %4 : vector<256x128xf32> to vector<256x128xbf16>
    %c0_4 = arith.constant 0 : index
    %c0_5 = arith.constant 0 : index
    %6 = vector.load %arg3[%c0_4, %c0_5] : memref<128x128xbf16, #tpu.memory_space<vmem>>, vector<128x128xbf16>
    %cst_6 = arith.constant dense<0.000000e+00> : vector<256x128xf32>
    %7 = tpu.matmul %5, %6, %cst_6 {dimension_numbers = #tpu.dot_dimension_numbers<[1], [0], [0], [1], [0, 0, 1, 1], [], []>} : vector<256x128xbf16>, vector<128x128xbf16>, vector<256x128xf32> -> vector<256x128xf32>
    %c0_7 = arith.constant 0 : index
    %c0_8 = arith.constant 0 : index
    %8 = vector.load %arg4[%c0_7, %c0_8] : memref<256x128xf32, #tpu.memory_space<vmem>>, vector<256x128xf32>
    tpu.vector_store %arg4[%c0_7, %c0_8], %7 {strides = array<i32>} : memref<256x128xf32, #tpu.memory_space<vmem>>, vector<256x128xf32>,
    return
  }
  func.func @transform_0(%arg0: i32) -> (i32, i32) {
    %c0_i32 = arith.constant 0 : i32
    %c0_i32_0 = arith.constant 0 : i32
    return %arg0, %c0_i32 : i32, i32
  }
  func.func @transform_1(%arg0: i32) -> (i32, i32) {
    %c0_i32 = arith.constant 0 : i32
    %c0_i32_0 = arith.constant 0 : i32
    %c0_i32_1 = arith.constant 0 : i32
    return %c0_i32, %c0_i32_0 : i32, i32
  }
  func.func @transform_2(%arg0: i32) -> (i32, i32) {
    %c0_i32 = arith.constant 0 : i32
    %c0_i32_0 = arith.constant 0 : i32
    %c0_i32_1 = arith.constant 0 : i32
    return %c0_i32, %c0_i32_0 : i32, i32
  }
  func.func @transform_3(%arg0: i32) -> (i32, i32) {
    %c0_i32 = arith.constant 0 : i32
    %c0_i32_0 = arith.constant 0 : i32
    return %arg0, %c0_i32 : i32, i32
  }
}

</mosaic_0001>

<bundles_post_ra>
// kernel: tpu_custom_call.1
= control target key start
LH: loop header
LB: loop body
LE: loop exit
PB: predicated region body
PF: predicated region fallthrough
CT: control target
= control target key end

     0   :  { %8 = vsyncpa [#allocation3], 0  ;;  %s1432_s0 = inlined_call_operand.vmem [shape: bf16[1024,16], index: 0, kind: input, shape index: {}]   ;;  %s1433_s1 = inlined_call_operand.vmem [shape: bf16[16,128], index: 1, kind: input, shape index: {}]   ;;  %s1434_s2 = inlined_call_operand.vmem [shape: bf16[128,128], index: 2, kind: input, shape index: {}]   ;;  %s1435_s3 = inlined_call_operand.hbm [shape: f32[1024,128], index: 3, kind: output, shape index: {}]  }
   0x1   :  { %10 = vsyncpa [#allocation3 + $0x1], 0  ;;  %s1230_s12 = smov 0   ;;  %s1232_s13 = smov 0  }
   0x2   :  { %s1234_s14 = smov 0   ;;  %s1236_s15 = smov 0  }
   0x3 LB: > { %s1251_s16 = sadd.s32 4294967295, %s1205_s15   ;;  %s884_s17 = sadd.s32 4294967294, %s1205_s15   ;;  %s1205_s15 = sphi %s1236_s15, %s1441_s15   ;;  %s1201_s14 = sphi %s1234_s14, %s1440_s14   ;;  %s1197_s13 = sphi %s1232_s13, %s1439_s13   ;;  %s1193_s12 = sphi %s1230_s12, %s1438_s12  }
   0x4   : > { %s1255_s18 = sadd.s32 1, %s1205_s15   ;;  %s91_s19 = sadd.s32 1, %s1201_s14 }
   0x5   : > { %s88_s20 = ssub.s32 %s1205_s15, %s1255_s18  ;;  %p101_p0 = scmp.ne.s32.totalorder %s1201_s14, %s1197_s13 }
   0x6   : > { %p89_p1 = scmp.eq.s32.totalorder %s88_s20, 0  ;;  %p102_p2 = scmp.eq.s32.totalorder %s1251_s16, 3 }
   0x7   : > { %p107_p3 = scmp.ne.s32.totalorder %s1197_s13, %s1193_s12  ;;  %p108_p4 = scmp.eq.s32.totalorder %s884_s17, 3 }
   0x8   : > { %s1266_s21 = scalar_select %p89_p1, %s1201_s14, %s91_s19  }
   0x9   : > { %p1268_p5 = por %p102_p2, %p101_p0  ;;  %p1272_p6 = por %p108_p4, %p107_p3 }
   0xa   : > { %p887_p7 = scmp.ge.s32.totalorder %s1205_s15, 1  ;;  %p141_p8 = scmp.lt.s32.totalorder %s1205_s15, 5 }
   0xc   : > { %p142_p9 = pnand %p887_p7, %p141_p8 }
   0xd   : > { %v1118_v0 = vld [vmem:[%s1433_s1] sm:$0xff] (!%p142_p9)   ;;  %s889_s26 = sshll.u32 (!%p142_p9), %s1251_s16, 5  ;;  %v1136_v2 = vld [vmem:[%s1434_s2 + $0x8] sm:$0xff] (!%p142_p9)   ;;  %vm293_vm0 = vcmask (!%p142_p9), 130048   ;;  %v1137_v3 = vld [vmem:[%s1434_s2 + $0x10] sm:$0xff] (!%p142_p9)   ;;  %s162_s29 = sand.u32 (!%p142_p9), 1, %s1197_s13  }
   0xe   : > { %145 = sbr.rel (%p142_p9) target bundleno = 532 (0x214), region = 32  ;;  %p166_p10 = scmp.lt.s32.totalorder (!%p142_p9), %s889_s26, 127  ;;  %979 = vmatprep.subr.bf16.mxu0 (!%p142_p9), %v1118_v0  ;;  %v1135_v1 = vld [vmem:[%s1434_s2] sm:$0xff] (!%p142_p9)   ;;  %v1138_v7 = vld [vmem:[%s1434_s2 + $0x18] sm:$0xff] (!%p142_p9)   ;;  %v1140_v13 = vld [vmem:[%s1434_s2 + $0x28] sm:$0xff] (!%p142_p9)  }
   0xf   : > { %980 = vmatpush3.bf16.msra.mxu0 (!%p142_p9), %v1118_v0  ;;  %1061 = vmatprep.subr.bf16.mxu1 (!%p142_p9), %v1135_v1  ;;  %v1139_v10 = vld [vmem:[%s1434_s2 + $0x20] sm:$0xff] (!%p142_p9)   ;;  %v1141_v23 = vld [vmem:[%s1434_s2 + $0x30] sm:$0xff] (!%p142_p9)   ;;  %v1142_v24 = vld [vmem:[%s1434_s2 + $0x38] sm:$0xff] (!%p142_p9)   ;;  %s888_s30 = sshll.u32 (!%p142_p9), %s162_s29, 8  ;;  %s937_s5 = sshll.u32 (!%p142_p9), %s1251_s16, 12 }
  0x10   : > { %1013 = vmatprep.subr.bf16.mxu0 (!%p142_p9), %v1135_v1  ;;  %1069 = vmatpush3.bf16.msra.mxu1 (!%p142_p9), %v1135_v1  ;;  %s1382_s9 = scalar_lea.hbm (!%p142_p9), %s1435_s3, %s937_s5  ;;  %s1391_s16 = scalar_lea.sflag (!%p142_p9), [#allocation3], %s162_s29 }
  0x11   : > { %1062 = vmatprep.subr.bf16.mxu1 (!%p142_p9), %v1136_v2  ;;  %s1207_s11 = smov (!%p142_p9), [#allocation2]  }
  0x12   : > { %s1147_s17 = sshll.u32 (!%p142_p9), %s1207_s11, 4  ;;  %s1148_s17 = int_to_ptr.vmem [resolvable:$false] %s1147_s17 }
  0x13   : > { %s1149_s19 = scalar_lea.vmem (!%p142_p9), %s1148_s17, 8192 }
  0x14   : > { %1070 = vmatpush3.bf16.msra.mxu1 (!%p142_p9), %v1136_v2 }
  0x15   : > { %s1443_s26 = smov (!%p166_p10, %s889_s26), 127  ;;  %1063 = vmatprep.subr.bf16.mxu1 %v1137_v3 }
  0x16   : > { %s890_s4 = sshll.u32 %s1443_s26, 2 }
  0x17   : > { %s1291_s7 = scalar_lea.vmem %s1432_s0, %s890_s4  ;;  %s1346_s4 = scalar_lea.vmem [#allocation2], %s888_s30 }
  0x18   : > { %v1119_v4 = vld [vmem:[%s1291_s7] sm:$0xff]   ;;  %v1120_v5 = vld [vmem:[%s1291_s7 + $0x8] sm:$0xff]   ;;  %v1121_v6 = vld [vmem:[%s1291_s7 + $0x10] sm:$0xff]   ;;  %1071 = vmatpush3.bf16.msra.mxu1 %v1137_v3  ;;  %s822_s6 = sshll.u32 %s1346_s4, 4  ;;  %s1384_s6 = int_to_ptr.vmem [resolvable:$true] %s822_s6 }
  0x19   : > { %981 = vmatprep.mubr.msk.bf16.mxu0 %vm293_vm0, %v1119_v4  ;;  %v1122_v8 = vld [vmem:[%s1291_s7 + $0x18] sm:$0xff]   ;;  %1064 = vmatprep.subr.bf16.mxu1 %v1138_v7  ;;  %v1123_v9 = vld [vmem:[%s1291_s7 + $0x20] sm:$0xff]   ;;  %v1124_v11 = vld [vmem:[%s1291_s7 + $0x28] sm:$0xff]   ;;  %s1143_s10 = scalar_lea.vmem %s1384_s6, 4096  ;;  %p1150_p0 = scmp.lt.s32.totalorder %s1384_s6, %s1148_s17 }
  0x1a   : > { %982 = vmatmul.mubr.msk.bf16.vlgmr.msra.gmra.mrb[0].mxu0 %vm293_vm0, %v1120_v5  ;;  %v1125_v12 = vld [vmem:[%s1291_s7 + $0x30] sm:$0xff]   ;;  %v1126_v14 = vld [vmem:[%s1291_s7 + $0x38] sm:$0xff]   ;;  %v1127_v15 = vld [vmem:[%s1291_s7 + $0x40] sm:$0xff]   ;;  %p1144_p11 = scmp.ne.s32.totalorder %s1384_s6, %s1143_s10  ;;  %p1151_p1 = scmp.lt.s32.totalorder %s1149_s19, %s1143_s10 }
  0x1b   : > { %985 = vmatprep.mubr.msk.bf16.mxu0 %vm293_vm0, %v1121_v6  ;;  %1014 = vmatpush3.bf16.msra.mxu0 %v1135_v1  ;;  %v1128_v16 = vld [vmem:[%s1291_s7 + $0x48] sm:$0xff]   ;;  %v1129_v17 = vld [vmem:[%s1291_s7 + $0x50] sm:$0xff]   ;;  %v1130_v18 = vld [vmem:[%s1291_s7 + $0x58] sm:$0xff]  }
  0x1c   : > { %1015 = vmatprep.subr.bf16.mxu0 %v1136_v2  ;;  %1072 = vmatpush3.bf16.msra.mxu1 %v1138_v7  ;;  %v1131_v19 = vld [vmem:[%s1291_s7 + $0x60] sm:$0xff]   ;;  %v1132_v20 = vld [vmem:[%s1291_s7 + $0x68] sm:$0xff]   ;;  %v1133_v21 = vld [vmem:[%s1291_s7 + $0x70] sm:$0xff]   ;;  %p1145_p12 = pnand %p1144_p11, %p1268_p5  ;;  %p1152_p2 = por %p1151_p1, %p1150_p0 }
  0x1d   : > { %1065 = vmatprep.subr.bf16.mxu1 %v1139_v10  ;;  %v1134_v22 = vld [vmem:[%s1291_s7 + $0x78] sm:$0xff]  }
  0x1e   : > { %p1146_p13 = pneg %p1145_p12 }
  0x1f   : > { %1016 = vmatpush3.bf16.msra.mxu0 %v1136_v2 }
  0x20   : > { %1017 = vmatprep.subr.bf16.mxu0 %v1137_v3  ;;  %1073 = vmatpush3.bf16.msra.mxu1 %v1139_v10  ;;  %p1153_p3 = pnand %p1152_p2, %p1146_p13 }
  0x21   : > { %1066 = vmatprep.subr.bf16.mxu1 %v1140_v13 }
  0x22   : > { %986 = vmatmul.mubr.msk.bf16.gmra.mrb[4].mxu0 %vm293_vm0, %v1122_v8 }
  0x23   : > { %989 = vmatprep.mubr.msk.bf16.mxu0 %vm293_vm0, %v1123_v9  ;;  %1018 = vmatpush3.bf16.msra.mxu0 %v1137_v3 }
  0x24   : > { %1019 = vmatprep.subr.bf16.mxu0 %v1138_v7  ;;  %1074 = vmatpush3.bf16.msra.mxu1 %v1140_v13 }
  0x25   : > { %1067 = vmatprep.subr.bf16.mxu1 %v1141_v23 }
  0x27   : > { %1020 = vmatpush3.bf16.msra.mxu0 %v1138_v7 }
  0x28   : > { %1021 = vmatprep.subr.bf16.mxu0 %v1139_v10  ;;  %1075 = vmatpush3.bf16.msra.mxu1 %v1141_v23 }
  0x29   : > { %1068 = vmatprep.subr.bf16.mxu1 %v1142_v24 }
  0x2a   : > { %990 = vmatmul.mubr.msk.bf16.gmra.mrb[8].mxu0 %vm293_vm0, %v1124_v11 }
  0x2b   : > { %993 = vmatprep.mubr.msk.bf16.mxu0 %vm293_vm0, %v1125_v12  ;;  %1022 = vmatpush3.bf16.msra.mxu0 %v1139_v10 }
  0x2c   : > { %1023 = vmatprep.subr.bf16.mxu0 %v1140_v13  ;;  %1076 = vmatpush3.bf16.msra.mxu1 %v1142_v24 }
  0x2f   : > { %1024 = vmatpush3.bf16.msra.mxu0 %v1140_v13 }
  0x30   : > { %1025 = vmatprep.subr.bf16.mxu0 %v1141_v23 }
  0x32   : > { %994 = vmatmul.mubr.msk.bf16.gmra.mrb[12].mxu0 %vm293_vm0, %v1126_v14 }
  0x33   : > { %997 = vmatprep.mubr.msk.bf16.mxu0 %vm293_vm0, %v1127_v15  ;;  %1026 = vmatpush3.bf16.msra.mxu0 %v1141_v23 }
  0x34   : > { %1027 = vmatprep.subr.bf16.mxu0 %v1142_v24 }
  0x37   : > { %1028 = vmatpush3.bf16.msra.mxu0 %v1142_v24 }
  0x3a   : > { %998 = vmatmul.mubr.msk.bf16.gmra.mrb[16].mxu0 %vm293_vm0, %v1128_v16 }
  0x3b   : > { %1001 = vmatprep.mubr.msk.bf16.mxu0 %vm293_vm0, %v1129_v17 }
  0x42   : > { %1002 = vmatmul.mubr.msk.bf16.gmra.mrb[20].mxu0 %vm293_vm0, %v1130_v18 }
  0x43   : > { %1005 = vmatprep.mubr.msk.bf16.mxu0 %vm293_vm0, %v1131_v19 }
  0x4a   : > { %1006 = vmatmul.mubr.msk.bf16.gmra.mrb[24].mxu0 %vm293_vm0, %v1132_v20 }
  0x4b   : > { %1009 = vmatprep.mubr.msk.bf16.mxu0 %vm293_vm0, %v1133_v21 }
  0x52   : > { %1010 = vmatmul.mubr.msk.bf16.gmra.mrb[28].mxu0 %vm293_vm0, %v1134_v22 }
  0xed   : > { %v983_v25 = vpop.f32.mrb[0].mxu0 }
  0xee   : > { %v376_v26 = vpop.f32.mrb[1].mxu0  ;;  %v505_v28 = vmax.f32 %v983_v25, 0.0 }
  0xef   : > { %v984_v27 = vpop.f32.mrb[2].mxu0  ;;  %v503_v31 = vmax.f32 %v376_v26, 0.0 }
  0xf0   : > { %v506_v29 = vmax.f32 %v984_v27, 0.0  ;;  %v379_v30 = vpop.f32.mrb[3].mxu0 }
  0xf1   : > { %v504_v32 = vmax.f32 %v379_v30, 0.0 }
  0xf2   : > { %v536_v33 = vpack.c.bf16 %v506_v29, %v505_v28 }
  0xf3   : > { %v535_v34 = vpack.c.bf16 %v504_v32, %v503_v31 }
  0xf5   : > { %v987_v35 = vpop.f32.mrb[4].mxu0  ;;  %1029 = vmatprep.mubr.bf16.mxu0 %v535_v34 }
  0xf6   : > { %v392_v36 = vpop.f32.mrb[5].mxu0  ;;  %1030 = vmatmul.mubr.bf16.vlgmr.msra.gmra.mrb[32].mxu0 %v536_v33  ;;  %v509_v38 = vmax.f32 %v987_v35, 0.0 }
  0xf7   : > { %v988_v37 = vpop.f32.mrb[6].mxu0  ;;  %v507_v41 = vmax.f32 %v392_v36, 0.0 }
  0xf8   : > { %v510_v39 = vmax.f32 %v988_v37, 0.0  ;;  %v395_v40 = vpop.f32.mrb[7].mxu0 }
  0xf9   : > { %v508_v42 = vmax.f32 %v395_v40, 0.0 }
  0xfa   : > { %v538_v43 = vpack.c.bf16 %v510_v39, %v509_v38 }
  0xfb   : > { %v537_v44 = vpack.c.bf16 %v508_v42, %v507_v41 }
  0xfd   : > { %v991_v45 = vpop.f32.mrb[8].mxu0  ;;  %1033 = vmatprep.mubr.bf16.mxu1 %v537_v44 }
  0xfe   : > { %v408_v46 = vpop.f32.mrb[9].mxu0  ;;  %1034 = vmatmul.mubr.bf16.vlgmr.msra.gmra.mrb[0].mxu1 %v538_v43  ;;  %v513_v48 = vmax.f32 %v991_v45, 0.0 }
  0xff   : > { %v992_v47 = vpop.f32.mrb[10].mxu0  ;;  %v511_v51 = vmax.f32 %v408_v46, 0.0 }
 0x100   : > { %v514_v49 = vmax.f32 %v992_v47, 0.0  ;;  %v411_v50 = vpop.f32.mrb[11].mxu0 }
 0x101   : > { %v512_v52 = vmax.f32 %v411_v50, 0.0 }
 0x102   : > { %v540_v53 = vpack.c.bf16 %v514_v49, %v513_v48 }
 0x103   : > { %v539_v54 = vpack.c.bf16 %v512_v52, %v511_v51 }
 0x105   : > { %v995_v55 = vpop.f32.mrb[12].mxu0  ;;  %1037 = vmatprep.mubr.bf16.mxu1 %v539_v54 }
 0x106   : > { %v424_v56 = vpop.f32.mrb[13].mxu0  ;;  %1038 = vmatmul.mubr.bf16.gmra.mrb[4].mxu1 %v540_v53  ;;  %v517_v58 = vmax.f32 %v995_v55, 0.0 }
 0x107   : > { %v996_v57 = vpop.f32.mrb[14].mxu0  ;;  %v515_v61 = vmax.f32 %v424_v56, 0.0 }
 0x108   : > { %v518_v59 = vmax.f32 %v996_v57, 0.0  ;;  %v427_v60 = vpop.f32.mrb[15].mxu0 }
 0x109   : > { %v516_v62 = vmax.f32 %v427_v60, 0.0 }
 0x10a   : > { %v542_v63 = vpack.c.bf16 %v518_v59, %v517_v58 }
 0x10b   : > { %v541_v0 = vpack.c.bf16 %v516_v62, %v515_v61 }
 0x10d   : > { %v999_v1 = vpop.f32.mrb[16].mxu0  ;;  %1041 = vmatprep.mubr.bf16.mxu1 %v541_v0 }
 0x10e   : > { %v440_v2 = vpop.f32.mrb[17].mxu0  ;;  %1042 = vmatmul.mubr.bf16.gmra.mrb[8].mxu1 %v542_v63  ;;  %v521_v4 = vmax.f32 %v999_v1, 0.0 }
 0x10f   : > { %v1000_v3 = vpop.f32.mrb[18].mxu0  ;;  %v519_v7 = vmax.f32 %v440_v2, 0.0 }
 0x110   : > { %v522_v5 = vmax.f32 %v1000_v3, 0.0  ;;  %v443_v6 = vpop.f32.mrb[19].mxu0 }
 0x111   : > { %v520_v8 = vmax.f32 %v443_v6, 0.0 }
 0x112   : > { %v544_v9 = vpack.c.bf16 %v522_v5, %v521_v4 }
 0x113   : > { %v543_v10 = vpack.c.bf16 %v520_v8, %v519_v7 }
 0x115   : > { %v1003_v11 = vpop.f32.mrb[20].mxu0  ;;  %1045 = vmatprep.mubr.bf16.mxu1 %v543_v10 }
 0x116   : > { %v456_v12 = vpop.f32.mrb[21].mxu0  ;;  %1046 = vmatmul.mubr.bf16.gmra.mrb[12].mxu1 %v544_v9  ;;  %v525_v14 = vmax.f32 %v1003_v11, 0.0 }
 0x117   : > { %v1004_v13 = vpop.f32.mrb[22].mxu0  ;;  %v523_v17 = vmax.f32 %v456_v12, 0.0 }
 0x118   : > { %v526_v15 = vmax.f32 %v1004_v13, 0.0  ;;  %v459_v16 = vpop.f32.mrb[23].mxu0 }
 0x119   : > { %v524_v18 = vmax.f32 %v459_v16, 0.0 }
 0x11a   : > { %v546_v19 = vpack.c.bf16 %v526_v15, %v525_v14 }
 0x11b   : > { %v545_v20 = vpack.c.bf16 %v524_v18, %v523_v17 }
 0x11d   : > { %v1007_v21 = vpop.f32.mrb[24].mxu0  ;;  %1049 = vmatprep.mubr.bf16.mxu1 %v545_v20 }
 0x11e   : > { %v472_v22 = vpop.f32.mrb[25].mxu0  ;;  %1050 = vmatmul.mubr.bf16.gmra.mrb[16].mxu1 %v546_v19  ;;  %v529_v24 = vmax.f32 %v1007_v21, 0.0 }
 0x11f   : > { %v1008_v23 = vpop.f32.mrb[26].mxu0  ;;  %v527_v27 = vmax.f32 %v472_v22, 0.0 }
 0x120   : > { %v530_v25 = vmax.f32 %v1008_v23, 0.0  ;;  %v475_v26 = vpop.f32.mrb[27].mxu0 }
 0x121   : > { %v528_v28 = vmax.f32 %v475_v26, 0.0 }
 0x122   : > { %v548_v29 = vpack.c.bf16 %v530_v25, %v529_v24 }
 0x123   : > { %v547_v30 = vpack.c.bf16 %v528_v28, %v527_v27 }
 0x125   : > { %v1011_v31 = vpop.f32.mrb[28].mxu0  ;;  %1053 = vmatprep.mubr.bf16.mxu1 %v547_v30 }
 0x126   : > { %v488_v32 = vpop.f32.mrb[29].mxu0  ;;  %1054 = vmatmul.mubr.bf16.gmra.mrb[20].mxu1 %v548_v29  ;;  %v533_v34 = vmax.f32 %v1011_v31, 0.0 }
 0x127   : > { %v1012_v33 = vpop.f32.mrb[30].mxu0  ;;  %v531_v37 = vmax.f32 %v488_v32, 0.0 }
 0x128   : > { %v534_v35 = vmax.f32 %v1012_v33, 0.0  ;;  %v491_v36 = vpop.f32.mrb[31].mxu0 }
 0x129   : > { %v532_v38 = vmax.f32 %v491_v36, 0.0 }
 0x12a   : > { %v550_v39 = vpack.c.bf16 %v534_v35, %v533_v34 }
 0x12b   : > { %v549_v40 = vpack.c.bf16 %v532_v38, %v531_v37 }
 0x12d   : > { %1057 = vmatprep.mubr.bf16.mxu1 %v549_v40 }
 0x12e   : > { %1058 = vmatmul.mubr.bf16.gmra.mrb[24].mxu1 %v550_v39 }
 0x1c9   : > { %v1031_v41 = vpop.f32.mrb[32].mxu0 }
 0x1ca   : > { %778 = vst [vmem:[%s1346_s4 + $0x10] sm:$0xff] %v1031_v41  ;;  %v649_v42 = vpop.f32.mrb[33].mxu0 }
 0x1cb   : > { %776 = vst [vmem:[%s1346_s4] sm:$0xff] %v649_v42  ;;  %v1032_v43 = vpop.f32.mrb[34].mxu0 }
 0x1cc   : > { %779 = vst [vmem:[%s1346_s4 + $0x18] sm:$0xff] %v1032_v43  ;;  %v652_v44 = vpop.f32.mrb[35].mxu0 }
 0x1cd   : > { %777 = vst [vmem:[%s1346_s4 + $0x8] sm:$0xff] %v652_v44 }
 0x1d1   : > { %v1035_v45 = vpop.f32.mrb[0].mxu1 }
 0x1d2   : > { %782 = vst [vmem:[%s1346_s4 + $0x30] sm:$0xff] %v1035_v45  ;;  %v665_v46 = vpop.f32.mrb[1].mxu1 }
 0x1d3   : > { %780 = vst [vmem:[%s1346_s4 + $0x20] sm:$0xff] %v665_v46  ;;  %v1036_v47 = vpop.f32.mrb[2].mxu1 }
 0x1d4   : > { %783 = vst [vmem:[%s1346_s4 + $0x38] sm:$0xff] %v1036_v47  ;;  %v668_v48 = vpop.f32.mrb[3].mxu1 }
 0x1d5   : > { %781 = vst [vmem:[%s1346_s4 + $0x28] sm:$0xff] %v668_v48 }
 0x1d9   : > { %v1039_v49 = vpop.f32.mrb[4].mxu1 }
 0x1da   : > { %786 = vst [vmem:[%s1346_s4 + $0x50] sm:$0xff] %v1039_v49  ;;  %v681_v50 = vpop.f32.mrb[5].mxu1 }
 0x1db   : > { %784 = vst [vmem:[%s1346_s4 + $0x40] sm:$0xff] %v681_v50  ;;  %v1040_v51 = vpop.f32.mrb[6].mxu1 }
 0x1dc   : > { %787 = vst [vmem:[%s1346_s4 + $0x58] sm:$0xff] %v1040_v51  ;;  %v684_v52 = vpop.f32.mrb[7].mxu1 }
 0x1dd   : > { %785 = vst [vmem:[%s1346_s4 + $0x48] sm:$0xff] %v684_v52 }
 0x1e1   : > { %v1043_v53 = vpop.f32.mrb[8].mxu1 }
 0x1e2   : > { %790 = vst [vmem:[%s1346_s4 + $0x70] sm:$0xff] %v1043_v53  ;;  %v697_v54 = vpop.f32.mrb[9].mxu1 }
 0x1e3   : > { %788 = vst [vmem:[%s1346_s4 + $0x60] sm:$0xff] %v697_v54  ;;  %v1044_v55 = vpop.f32.mrb[10].mxu1 }
 0x1e4   : > { %791 = vst [vmem:[%s1346_s4 + $0x78] sm:$0xff] %v1044_v55  ;;  %v700_v56 = vpop.f32.mrb[11].mxu1 }
 0x1e5   : > { %789 = vst [vmem:[%s1346_s4 + $0x68] sm:$0xff] %v700_v56 }
 0x1e9   : > { %v1047_v57 = vpop.f32.mrb[12].mxu1 }
 0x1ea   : > { %794 = vst [vmem:[%s1346_s4 + $0x90] sm:$0xff] %v1047_v57  ;;  %v713_v58 = vpop.f32.mrb[13].mxu1 }
 0x1eb   : > { %792 = vst [vmem:[%s1346_s4 + $0x80] sm:$0xff] %v713_v58  ;;  %v1048_v59 = vpop.f32.mrb[14].mxu1 }
 0x1ec   : > { %795 = vst [vmem:[%s1346_s4 + $0x98] sm:$0xff] %v1048_v59  ;;  %v716_v60 = vpop.f32.mrb[15].mxu1 }
 0x1ed   : > { %793 = vst [vmem:[%s1346_s4 + $0x88] sm:$0xff] %v716_v60 }
 0x1f1   : > { %v1051_v61 = vpop.f32.mrb[16].mxu1 }
 0x1f2   : > { %798 = vst [vmem:[%s1346_s4 + $0xb0] sm:$0xff] %v1051_v61  ;;  %v729_v62 = vpop.f32.mrb[17].mxu1 }
 0x1f3   : > { %796 = vst [vmem:[%s1346_s4 + $0xa0] sm:$0xff] %v729_v62  ;;  %v1052_v63 = vpop.f32.mrb[18].mxu1 }
 0x1f4   : > { %799 = vst [vmem:[%s1346_s4 + $0xb8] sm:$0xff] %v1052_v63  ;;  %v732_v0 = vpop.f32.mrb[19].mxu1 }
 0x1f5   : > { %797 = vst [vmem:[%s1346_s4 + $0xa8] sm:$0xff] %v732_v0 }
 0x1f9   : > { %v1055_v1 = vpop.f32.mrb[20].mxu1 }
 0x1fa   : > { %802 = vst [vmem:[%s1346_s4 + $0xd0] sm:$0xff] %v1055_v1  ;;  %v745_v2 = vpop.f32.mrb[21].mxu1 }
 0x1fb   : > { %800 = vst [vmem:[%s1346_s4 + $0xc0] sm:$0xff] %v745_v2  ;;  %v1056_v3 = vpop.f32.mrb[22].mxu1 }
 0x1fc   : > { %803 = vst [vmem:[%s1346_s4 + $0xd8] sm:$0xff] %v1056_v3  ;;  %v748_v4 = vpop.f32.mrb[23].mxu1 }
 0x1fd   : > { %801 = vst [vmem:[%s1346_s4 + $0xc8] sm:$0xff] %v748_v4 }
 0x201   : > { %v1059_v5 = vpop.f32.mrb[24].mxu1 }
 0x202   : > { %806 = vst [vmem:[%s1346_s4 + $0xf0] sm:$0xff] %v1059_v5  ;;  %v761_v6 = vpop.f32.mrb[25].mxu1 }
 0x203   : > { %804 = vst [vmem:[%s1346_s4 + $0xe0] sm:$0xff] %v761_v6  ;;  %v1060_v7 = vpop.f32.mrb[26].mxu1 }
 0x204   : > { %807 = vst [vmem:[%s1346_s4 + $0xf8] sm:$0xff] %v1060_v7  ;;  %v764_v8 = vpop.f32.mrb[27].mxu1 }
 0x205   : > { %805 = vst [vmem:[%s1346_s4 + $0xe8] sm:$0xff] %v764_v8 }
 0x206   : > { %1156 = shalt.err (!%p1153_p3)
}
 0x207   : > { %s1157_s20 = scalar_lea.hbm %s1382_s9, 4096  ;;  %s1161_s26 = scalar_lea.hbm %s1435_s3, 16384 }
 0x208   : > { %p1158_p4 = scmp.ne.s32.totalorder %s1382_s9, %s1157_s20  ;;  %p1162_p9 = scmp.lt.u32.totalorder %s1382_s9, %s1435_s3 }
 0x209   : > { %p1163_p10 = scmp.lt.u32.totalorder %s1161_s26, %s1157_s20  ;;  %p1165_p12 = scmp.lt.u32.totalorder %s1157_s20, %s1382_s9 }
 0x20a   : > { %p1159_p7 = pnand %p1158_p4, %p1268_p5 }
 0x20b   : > { %p1164_p11 = por %p1163_p10, %p1162_p9 }
 0x20c   : > { %p1160_p8 = pneg %p1159_p7 }
 0x20d   : > { %p1166_p13 = por %p1165_p12, %p1164_p11 }
 0x20f   : > { %p1167_p0 = pnand %p1166_p13, %p1160_p8 }
 0x211   : > { %1170 = shalt.err (!%p1167_p0)
}
 0x212   : > { %s1208_s29 = smov 128   ;;  %s1209_s30 = smov 8  }
 0x213   : > { %1077 = dma.vmem_to_hbm [thread:$0]  (%p1268_p5), %s1384_s6, 4096, %s1382_s9, %s1391_s16, %s1208_s29, %s1208_s29, %s1209_s30  }
 0x214 PF: > { %p1083_p1 = scmp.ge.s32.totalorder %s1205_s15, 2  ;;  %s837_s4 = sand.u32 1, %s1193_s12  }
 0x215   : > { %s838_s5 = scalar_lea.sflag [#allocation3], %s837_s4 }
 0x216   : > { %p1080_p2 = pnand %p1083_p1, %p1272_p6 }
 0x218   : > { %1188 = dma.done.wait (!%p1080_p2), %s838_s5, 4096  }
 0x219   : > { %1190 = vsyncadd (!%p1080_p2), %s838_s5, 4294963200  ;;  %p13_p3 = scmp.ge.s32.totalorder %s1255_s18, 6   ;;  %s1438_s12 = smov %s1197_s13 }
 0x21a   : > { %s1439_s13 = smov %s1201_s14  ;;  %s1440_s14 = smov %s1266_s21 }
 0x21b   : > { %s1441_s15 = smov %s1255_s18  ;;  %15 = sbr.rel (!%p13_p3) target bundleno = 3 (0x3), region = 67 }
 0x222   :  { %843 = vsyncpa [#allocation3], 1 }
 0x223   :  { %845 = vsyncpa [#allocation3 + $0x1], 1 }

</bundles_post_ra>
